<compile_context>
chip_gen: v5e
topology: v5e:2x2
jax: 0.10.0
libtpu: 0.0.40
codegen_flags: <defaults>
</compile_context>

<pallas_src>
import functools

import jax
import jax.numpy as jnp
from jax.experimental import pallas as pl
from jax.experimental.pallas import tpu as pltpu


def _triplet_partial_kernel(a_ref, p_ref, ni_ref, ne_ref, out_ref, acc_ref,
                            *, margin, eps, batch, tile_b, tiles_per_core,
                            ragged):
    i = pl.program_id(1)                       # reduction (tile) axis

    # ---- init per-core accumulators on the first tile -----------------------
    @pl.when(i == 0)
    def _():
        acc_ref[0] = 0.0
        acc_ref[1] = 0.0

    # ---- per-tile compute (cast to f32 in-kernel; inputs may be bf16) -------
    a = a_ref[...].astype(jnp.float32)
    p = p_ref[...].astype(jnp.float32)
    ni = ni_ref[...].astype(jnp.float32)
    ne = ne_ref[...].astype(jnp.float32)

    # F.pairwise_distance(x1, x2, p=2, eps=1e-6): ||x1 - x2 + eps||_2 over the
    # feature (lane) axis.  keepdims -> (TB, 1) so any mask stays 2-D.
    d_ap = jnp.sqrt(jnp.sum((a - p + eps) ** 2, axis=-1, keepdims=True))
    d_intra = jnp.sqrt(jnp.sum((a - ni + eps) ** 2, axis=-1, keepdims=True))
    d_inter = jnp.sqrt(jnp.sum((a - ne + eps) ** 2, axis=-1, keepdims=True))

    hinge_intra = jnp.maximum(d_ap - d_intra + margin, 0.0)   # (TB, 1)
    hinge_inter = jnp.maximum(d_ap - d_inter + margin, 0.0)   # (TB, 1)

    if not ragged:
        # Exactly divisible: no mask code is emitted at all.
        acc_ref[0] += jnp.sum(hinge_intra)
        acc_ref[1] += jnp.sum(hinge_inter)
    else:
        # Nominal (unclamped) global start row of this tile.  Tiles whose
        # nominal rows lie fully/partially beyond the true batch are masked;
        # full tiles skip the mask entirely via pl.when.
        c = pl.program_id(0)
        start = (c * tiles_per_core + i) * tile_b
        is_full = start + tile_b <= batch

        @pl.when(is_full)
        def _():
            acc_ref[0] += jnp.sum(hinge_intra)
            acc_ref[1] += jnp.sum(hinge_inter)

        @pl.when(jnp.logical_not(is_full))
        def _():
            row = jax.lax.broadcasted_iota(jnp.int32, (tile_b, 1), 0) + start
            valid = row < batch
            # jnp.where (not multiply) so garbage/NaN in padded rows is fully
            # suppressed before accumulation.
            acc_ref[0] += jnp.sum(jnp.where(valid, hinge_intra, 0.0))
            acc_ref[1] += jnp.sum(jnp.where(valid, hinge_inter, 0.0))

    # ---- finalize: write this core's partial sums into its output block -----
    @pl.when(i == pl.num_programs(1) - 1)
    def _():
        lane = jax.lax.broadcasted_iota(jnp.int32, (8, 128), 1)
        tile = jnp.where(lane == 0, acc_ref[0],
                         jnp.where(lane == 1, acc_ref[1], 0.0))
        out_ref[0] = tile


def make_intra_inter_triplet_loss(w_intra=0.5, w_inter=0.2, margin=0.1, eps=1e-6,
                                  tile_b=None, num_cores=None,
                                  vmem_limit_bytes=None):
    """Returns fn(a, p, n_intra, n_inter) -> (loss, intra_loss, inter_loss).

    Inputs are (B, D).  Storing them in bfloat16 is recommended: HBM bytes are
    the binding resource on every TPU generation, and the kernel casts to f32
    internally, so bf16 inputs halve the dominant cost with no accuracy change
    in the accumulation.
    """

    def fn(a, p, n_intra, n_inter):
        B, D = a.shape
        itemsize = jnp.dtype(a.dtype).itemsize

        # ---- generation-aware budgets --------------------------------------
        try:
            cap = int(pltpu.get_tpu_info().vmem_capacity_bytes)
        except Exception:
            cap = None
        if vmem_limit_bytes is not None:
            vlimit = int(vmem_limit_bytes)
        elif cap is not None:
            # 96 MiB on v5e/v6e (128 MiB physical), 48 MiB on v7x (64 MiB).
            vlimit = min(3 * cap // 4, 96 * 1024 * 1024)
        else:
            vlimit = 48 * 1024 * 1024            # safe on all generations
        if num_cores is not None:
            nc = int(num_cores)
        elif cap is not None and cap <= 64 * 1024 * 1024:
            nc = 2                               # v7x-like: 2 TCs per chip
        else:
            nc = 1

        # ---- tile sizing: let the VMEM budget be the limiter ---------------
        # 4 inputs x 2 pipeline buffers, budgeted at f32 width (temporaries
        # are f32 even for bf16 inputs); ~40% of the scoped limit goes to the
        # pipelined blocks, the rest covers in-kernel f32 temporaries.
        pack = {1: 32, 2: 16}.get(itemsize, 8)   # sublane packing per dtype
        row_bytes_f32 = D * 4
        cap_rows = max(pack, int(0.4 * vlimit) // (4 * 2 * row_bytes_f32))
        tb = cap_rows if tile_b is None else int(tile_b)
        if tb >= B:
            tb = B                               # full batch in one tile
        else:
            tb = max(pack, (tb // pack) * pack)  # packing-aligned tile

        tiles_total = pl.cdiv(B, tb)
        nc = min(nc, tiles_total)                # never more cores than tiles
        tpc = pl.cdiv(tiles_total, nc)           # tiles per core
        ragged = (nc * tpc * tb != B)

        # Clamp the block index so padded per-core tiles never request a block
        # fully outside the array; their contribution is masked to zero anyway.
        last_blk = tiles_total - 1
        if nc * tpc == tiles_total:
            def in_idx(c, i):
                return (c * tpc + i, 0)
        else:
            def in_idx(c, i):
                return (jnp.minimum(c * tpc + i, last_blk), 0)

        kernel = functools.partial(
            _triplet_partial_kernel,
            margin=float(margin), eps=float(eps),
            batch=int(B), tile_b=int(tb),
            tiles_per_core=int(tpc), ragged=bool(ragged),
        )

        in_spec = pl.BlockSpec((tb, D), in_idx)
        parts = pl.pallas_call(
            kernel,
            out_shape=jax.ShapeDtypeStruct((nc, 8, 128), jnp.float32),
            grid_spec=pltpu.PrefetchScalarGridSpec(
                num_scalar_prefetch=0,
                grid=(nc, tpc),
                in_specs=[in_spec, in_spec, in_spec, in_spec],
                out_specs=pl.BlockSpec((1, 8, 128), lambda c, i: (c, 0, 0)),
                scratch_shapes=[pltpu.SMEM((2,), jnp.float32)],
            ),
            compiler_params=pltpu.CompilerParams(
                dimension_semantics=("parallel", "arbitrary"),
                vmem_limit_bytes=int(vlimit),
            ),
        )(a, p, n_intra, n_inter)

        # Combine per-core partial sums (tiny, plain-JAX epilogue).
        intra = jnp.sum(parts[:, 0, 0]) / B
        inter = jnp.sum(parts[:, 0, 1]) / B
        loss = w_intra * intra + w_inter * inter
        return loss, intra, inter

    return fn


def _reference(a, p, n_intra, n_inter, w_intra=0.5, w_inter=0.2, margin=0.1, eps=1e-6):
    """Pure-JAX reference mirroring torch.nn.TripletMarginLoss (f32 compute)."""
    a, p = a.astype(jnp.float32), p.astype(jnp.float32)
    n_intra, n_inter = n_intra.astype(jnp.float32), n_inter.astype(jnp.float32)

    def dist(x, y):
        return jnp.sqrt(jnp.sum((x - y + eps) ** 2, axis=-1))

    d_ap = dist(a, p)
    intra = jnp.mean(jnp.maximum(d_ap - dist(a, n_intra) + margin, 0.0))
    inter = jnp.mean(jnp.maximum(d_ap - dist(a, n_inter) + margin, 0.0))
    return w_intra * intra + w_inter * inter, intra, inter


if __name__ == "__main__":
    key = jax.random.PRNGKey(0)

    # ---- Case 1: small f32 batch, auto tile size (single tile) --------------
    B, D = 8, 128
    ka, kp, kni, kne = jax.random.split(key, 4)
    a = jax.random.normal(ka, (B, D), dtype=jnp.float32)
    p = jax.random.normal(kp, (B, D), dtype=jnp.float32)
    n_intra = jax.random.normal(kni, (B, D), dtype=jnp.float32)
    n_inter = jax.random.normal(kne, (B, D), dtype=jnp.float32)

    loss_fn = make_intra_inter_triplet_loss(w_intra=0.5, w_inter=0.2, margin=0.1)
    out1 = loss_fn(a, p, n_intra, n_inter)
    jax.block_until_ready(out1)
    ref1 = _reference(a, p, n_intra, n_inter)
    for got, exp in zip(out1, ref1):
        assert jnp.allclose(got, exp, atol=1e-5, rtol=1e-5), (got, exp)

    # ---- Case 2: multi-tile with ragged tail, bf16 inputs --------------------
    B2, D2 = 20, 256
    k2 = jax.random.split(jax.random.PRNGKey(1), 4)
    a2 = jax.random.normal(k2[0], (B2, D2), dtype=jnp.float32).astype(jnp.bfloat16)
    p2 = jax.random.normal(k2[1], (B2, D2), dtype=jnp.float32).astype(jnp.bfloat16)
    ni2 = jax.random.normal(k2[2], (B2, D2), dtype=jnp.float32).astype(jnp.bfloat16)
    ne2 = jax.random.normal(k2[3], (B2, D2), dtype=jnp.float32).astype(jnp.bfloat16)

    # tile_b=16 (bf16 sublane packing) -> 2 tiles over B2=20, exercising the
    # partial-tile mask path.
    loss_fn2 = make_intra_inter_triplet_loss(w_intra=0.5, w_inter=0.2, margin=0.1,
                                             tile_b=16)
    out2 = loss_fn2(a2, p2, ni2, ne2)
    jax.block_until_ready(out2)
    ref2 = _reference(a2, p2, ni2, ne2)
    for got, exp in zip(out2, ref2):
        assert jnp.allclose(got, exp, atol=1e-5, rtol=1e-5), (got, exp)

    # ---- Case 3: forced 2-core split (v7x path), padded per-core tiles ------
    # On a single-TensorCore chip this runs the parallel axis sequentially,
    # validating the per-core partial-sum + clamped-duplicate-tile logic.
    B3, D3 = 20, 128
    k3 = jax.random.split(jax.random.PRNGKey(2), 4)
    a3 = jax.random.normal(k3[0], (B3, D3), dtype=jnp.float32)
    p3 = jax.random.normal(k3[1], (B3, D3), dtype=jnp.float32)
    ni3 = jax.random.normal(k3[2], (B3, D3), dtype=jnp.float32)
    ne3 = jax.random.normal(k3[3], (B3, D3), dtype=jnp.float32)

    loss_fn3 = make_intra_inter_triplet_loss(w_intra=0.5, w_inter=0.2, margin=0.1,
                                             tile_b=8, num_cores=2)
    out3 = loss_fn3(a3, p3, ni3, ne3)
    jax.block_until_ready(out3)
    ref3 = _reference(a3, p3, ni3, ne3)
    for got, exp in zip(out3, ref3):
        assert jnp.allclose(got, exp, atol=1e-5, rtol=1e-5), (got, exp)

    print("KERNEL_OK")
</pallas_src>

<mosaic_0001>
module attributes {stable_mosaic.version = 11 : i64} {
  func.func @_triplet_partial_kernel(%arg0: i32, %arg1: i32, %arg2: memref<8x128xf32, #tpu.memory_space<vmem>>, %arg3: memref<8x128xf32, #tpu.memory_space<vmem>>, %arg4: memref<8x128xf32, #tpu.memory_space<vmem>>, %arg5: memref<8x128xf32, #tpu.memory_space<vmem>>, %arg6: memref<1x8x128xf32, #tpu.memory_space<vmem>>, %arg7: memref<2xf32, #tpu.memory_space<smem>>) attributes {dimension_semantics = [#tpu.dimension_semantics<parallel>, #tpu.dimension_semantics<arbitrary>], iteration_bounds = array<i64: 1, 1>, scalar_prefetch = 0 : i64, scratch_operands = 1 : i64, tpu.core_type = #tpu.core_type<tc>, window_params = [{transform_indices = @transform_0, window_bounds = array<i64: 8, 128>}, {transform_indices = @transform_1, window_bounds = array<i64: 8, 128>}, {transform_indices = @transform_2, window_bounds = array<i64: 8, 128>}, {transform_indices = @transform_3, window_bounds = array<i64: 8, 128>}, {transform_indices = @transform_4, window_bounds = array<i64: 1, 8, 128>}]} {
    %c0_i32 = arith.constant 0 : i32
    %0 = arith.cmpi eq, %arg1, %c0_i32 : i32
    %1 = arith.extui %0 : i1 to i32
    %c0_i32_0 = arith.constant 0 : i32
    %2 = arith.cmpi ne, %1, %c0_i32_0 : i32
    scf.if %2 {
      %cst_24 = arith.constant 0.000000e+00 : f32
      %c0_25 = arith.constant 0 : index
      %55 = memref.load %arg7[%c0_25] : memref<2xf32, #tpu.memory_space<smem>>
      memref.store %cst_24, %arg7[%c0_25] : memref<2xf32, #tpu.memory_space<smem>>
      %cst_26 = arith.constant 0.000000e+00 : f32
      %c1_27 = arith.constant 1 : index
      %56 = memref.load %arg7[%c1_27] : memref<2xf32, #tpu.memory_space<smem>>
      memref.store %cst_26, %arg7[%c1_27] : memref<2xf32, #tpu.memory_space<smem>>
    } else {
    }
    %c0 = arith.constant 0 : index
    %c0_1 = arith.constant 0 : index
    %3 = vector.load %arg2[%c0, %c0_1] : memref<8x128xf32, #tpu.memory_space<vmem>>, vector<8x128xf32>
    %c0_2 = arith.constant 0 : index
    %c0_3 = arith.constant 0 : index
    %4 = vector.load %arg3[%c0_2, %c0_3] : memref<8x128xf32, #tpu.memory_space<vmem>>, vector<8x128xf32>
    %c0_4 = arith.constant 0 : index
    %c0_5 = arith.constant 0 : index
    %5 = vector.load %arg4[%c0_4, %c0_5] : memref<8x128xf32, #tpu.memory_space<vmem>>, vector<8x128xf32>
    %c0_6 = arith.constant 0 : index
    %c0_7 = arith.constant 0 : index
    %6 = vector.load %arg5[%c0_6, %c0_7] : memref<8x128xf32, #tpu.memory_space<vmem>>, vector<8x128xf32>
    %7 = arith.subf %3, %4 : vector<8x128xf32>
    %cst = arith.constant 9.99999997E-7 : f32
    %8 = vector.broadcast %cst : f32 to vector<8x128xf32>
    %9 = arith.addf %7, %8 : vector<8x128xf32>
    %10 = arith.mulf %9, %9 : vector<8x128xf32>
    %cst_8 = arith.constant dense<0.000000e+00> : vector<8xf32>
    %11 = vector.multi_reduction <add>, %10, %cst_8 [1] : vector<8x128xf32> to vector<8xf32>
    %12 = vector.shape_cast %11 : vector<8xf32> to vector<8x1xf32>
    %13 = math.sqrt %12 : vector<8x1xf32>
    %14 = arith.subf %3, %5 : vector<8x128xf32>
    %cst_9 = arith.constant 9.99999997E-7 : f32
    %15 = vector.broadcast %cst_9 : f32 to vector<8x128xf32>
    %16 = arith.addf %14, %15 : vector<8x128xf32>
    %17 = arith.mulf %16, %16 : vector<8x128xf32>
    %cst_10 = arith.constant dense<0.000000e+00> : vector<8xf32>
    %18 = vector.multi_reduction <add>, %17, %cst_10 [1] : vector<8x128xf32> to vector<8xf32>
    %19 = vector.shape_cast %18 : vector<8xf32> to vector<8x1xf32>
    %20 = math.sqrt %19 : vector<8x1xf32>
    %21 = arith.subf %3, %6 : vector<8x128xf32>
    %cst_11 = arith.constant 9.99999997E-7 : f32
    %22 = vector.broadcast %cst_11 : f32 to vector<8x128xf32>
    %23 = arith.addf %21, %22 : vector<8x128xf32>
    %24 = arith.mulf %23, %23 : vector<8x128xf32>
    %cst_12 = arith.constant dense<0.000000e+00> : vector<8xf32>
    %25 = vector.multi_reduction <add>, %24, %cst_12 [1] : vector<8x128xf32> to vector<8xf32>
    %26 = vector.shape_cast %25 : vector<8xf32> to vector<8x1xf32>
    %27 = math.sqrt %26 : vector<8x1xf32>
    %28 = arith.subf %13, %20 : vector<8x1xf32>
    %cst_13 = arith.constant 1.000000e-01 : f32
    %29 = vector.broadcast %cst_13 : f32 to vector<8x1xf32>
    %30 = arith.addf %28, %29 : vector<8x1xf32>
    %cst_14 = arith.constant 0.000000e+00 : f32
    %31 = vector.broadcast %cst_14 : f32 to vector<8x1xf32>
    %32 = arith.maximumf %30, %31 : vector<8x1xf32>
    %33 = arith.subf %13, %27 : vector<8x1xf32>
    %cst_15 = arith.constant 1.000000e-01 : f32
    %34 = vector.broadcast %cst_15 : f32 to vector<8x1xf32>
    %35 = arith.addf %33, %34 : vector<8x1xf32>
    %cst_16 = arith.constant 0.000000e+00 : f32
    %36 = vector.broadcast %cst_16 : f32 to vector<8x1xf32>
    %37 = arith.maximumf %35, %36 : vector<8x1xf32>
    %c0_17 = arith.constant 0 : index
    %38 = memref.load %arg7[%c0_17] : memref<2xf32, #tpu.memory_space<smem>>
    %39 = vector.shape_cast %32 : vector<8x1xf32> to vector<1x8x1xf32>
    %cst_18 = arith.constant dense<0.000000e+00> : vector<1xf32>
    %40 = vector.multi_reduction <add>, %39, %cst_18 [1, 2] : vector<1x8x1xf32> to vector<1xf32>
    %41 = vector.shape_cast %40 : vector<1xf32> to vector<1x1x1xf32>
    %42 = vector.extract %41[0, 0, 0] : f32 from vector<1x1x1xf32>
    %43 = arith.addf %38, %42 : f32
    %c0_19 = arith.constant 0 : index
    %44 = memref.load %arg7[%c0_19] : memref<2xf32, #tpu.memory_space<smem>>
    memref.store %43, %arg7[%c0_19] : memref<2xf32, #tpu.memory_space<smem>>
    %c1 = arith.constant 1 : index
    %45 = memref.load %arg7[%c1] : memref<2xf32, #tpu.memory_space<smem>>
    %46 = vector.shape_cast %37 : vector<8x1xf32> to vector<1x8x1xf32>
    %cst_20 = arith.constant dense<0.000000e+00> : vector<1xf32>
    %47 = vector.multi_reduction <add>, %46, %cst_20 [1, 2] : vector<1x8x1xf32> to vector<1xf32>
    %48 = vector.shape_cast %47 : vector<1xf32> to vector<1x1x1xf32>
    %49 = vector.extract %48[0, 0, 0] : f32 from vector<1x1x1xf32>
    %50 = arith.addf %45, %49 : f32
    %c1_21 = arith.constant 1 : index
    %51 = memref.load %arg7[%c1_21] : memref<2xf32, #tpu.memory_space<smem>>
    memref.store %50, %arg7[%c1_21] : memref<2xf32, #tpu.memory_space<smem>>
    %c0_i32_22 = arith.constant 0 : i32
    %52 = arith.cmpi eq, %arg1, %c0_i32_22 : i32
    %53 = arith.extui %52 : i1 to i32
    %c0_i32_23 = arith.constant 0 : i32
    %54 = arith.cmpi ne, %53, %c0_i32_23 : i32
    scf.if %54 {
      %55 = tpu.iota {dimensions = array<i32: 1>} : vector<8x128xi32>
      %c0_i32_24 = arith.constant 0 : i32
      %56 = vector.broadcast %c0_i32_24 : i32 to vector<8x128xi32>
      %57 = arith.cmpi eq, %55, %56 : vector<8x128xi32>
      %c0_25 = arith.constant 0 : index
      %58 = memref.load %arg7[%c0_25] : memref<2xf32, #tpu.memory_space<smem>>
      %c1_i32 = arith.constant 1 : i32
      %59 = vector.broadcast %c1_i32 : i32 to vector<8x128xi32>
      %60 = arith.cmpi eq, %55, %59 : vector<8x128xi32>
      %c1_26 = arith.constant 1 : index
      %61 = memref.load %arg7[%c1_26] : memref<2xf32, #tpu.memory_space<smem>>
      %cst_27 = arith.constant 0.000000e+00 : f32
      %62 = vector.broadcast %61 : f32 to vector<8x128xf32>
      %63 = vector.broadcast %cst_27 : f32 to vector<8x128xf32>
      %64 = arith.select %60, %62, %63 : vector<8x128xi1>, vector<8x128xf32>
      %65 = vector.broadcast %58 : f32 to vector<8x128xf32>
      %66 = arith.select %57, %65, %64 : vector<8x128xi1>, vector<8x128xf32>
      %c0_28 = arith.constant 0 : index
      %c0_29 = arith.constant 0 : index
      %c0_30 = arith.constant 0 : index
      %67 = vector.load %arg6[%c0_28, %c0_29, %c0_30] : memref<1x8x128xf32, #tpu.memory_space<vmem>>, vector<1x8x128xf32>
      %68 = vector.shape_cast %67 : vector<1x8x128xf32> to vector<8x128xf32>
      %69 = vector.shape_cast %66 : vector<8x128xf32> to vector<1x8x128xf32>
      tpu.vector_store %arg6[%c0_28, %c0_29, %c0_30], %69 {strides = array<i32>} : memref<1x8x128xf32, #tpu.memory_space<vmem>>, vector<1x8x128xf32>,
    } else {
    }
    return
  }
  func.func @transform_0(%arg0: i32, %arg1: i32) -> (i32, i32) {
    %c1_i32 = arith.constant 1 : i32
    %0 = arith.muli %arg0, %c1_i32 : i32
    %1 = arith.addi %0, %arg1 : i32
    %c0_i32 = arith.constant 0 : i32
    %c0_i32_0 = arith.constant 0 : i32
    return %1, %c0_i32 : i32, i32
  }
  func.func @transform_1(%arg0: i32, %arg1: i32) -> (i32, i32) {
    %c1_i32 = arith.constant 1 : i32
    %0 = arith.muli %arg0, %c1_i32 : i32
    %1 = arith.addi %0, %arg1 : i32
    %c0_i32 = arith.constant 0 : i32
    %c0_i32_0 = arith.constant 0 : i32
    return %1, %c0_i32 : i32, i32
  }
  func.func @transform_2(%arg0: i32, %arg1: i32) -> (i32, i32) {
    %c1_i32 = arith.constant 1 : i32
    %0 = arith.muli %arg0, %c1_i32 : i32
    %1 = arith.addi %0, %arg1 : i32
    %c0_i32 = arith.constant 0 : i32
    %c0_i32_0 = arith.constant 0 : i32
    return %1, %c0_i32 : i32, i32
  }
  func.func @transform_3(%arg0: i32, %arg1: i32) -> (i32, i32) {
    %c1_i32 = arith.constant 1 : i32
    %0 = arith.muli %arg0, %c1_i32 : i32
    %1 = arith.addi %0, %arg1 : i32
    %c0_i32 = arith.constant 0 : i32
    %c0_i32_0 = arith.constant 0 : i32
    return %1, %c0_i32 : i32, i32
  }
  func.func @transform_4(%arg0: i32, %arg1: i32) -> (i32, i32, i32) {
    %c0_i32 = arith.constant 0 : i32
    %c0_i32_0 = arith.constant 0 : i32
    %c0_i32_1 = arith.constant 0 : i32
    return %arg0, %c0_i32, %c0_i32_0 : i32, i32, i32
  }
}

</mosaic_0001>

<bundles_post_ra>
// kernel: tpu_custom_call.1
= control target key start
LH: loop header
LB: loop body
LE: loop exit
PB: predicated region body
PF: predicated region fallthrough
CT: control target
= control target key end

     0   :  { %9 = vsyncpa [#allocation4], 0  ;;  %s410_s0 = inlined_call_operand.hbm [shape: f32[8,128], index: 0, kind: input, shape index: {}]   ;;  %s411_s1 = inlined_call_operand.hbm [shape: f32[8,128], index: 1, kind: input, shape index: {}]   ;;  %s412_s2 = inlined_call_operand.hbm [shape: f32[8,128], index: 2, kind: input, shape index: {}]   ;;  %s413_s3 = inlined_call_operand.hbm [shape: f32[8,128], index: 3, kind: input, shape index: {}]   ;;  %s414_s4 = inlined_call_operand.hbm [shape: f32[1,8,128], index: 4, kind: output, shape index: {}]  }
   0x1   :  { %10 = vsyncpa [#allocation7], 0 }
   0x2   :  { %11 = vsyncpa [#allocation10], 0  ;;  %s35_s17 = sshll.u32 %s411_s1, 4  ;;  %s36_s17 = int_to_ptr.hbm [resolvable:$true] %s35_s17 }
   0x3   :  { %12 = vsyncpa [#allocation5], 0  ;;  %s365_s18 = smov [#allocation6]   ;;  %s21_s22 = sshll.u32 %s410_s0, 4  ;;  %s22_s22 = int_to_ptr.hbm [resolvable:$true] %s21_s22 }
   0x4   :  { %s37_s19 = sshll.u32 %s365_s18, 4  ;;  %s366_s23 = smov [#allocation3]   ;;  %s38_s19 = int_to_ptr.vmem [resolvable:$true] %s37_s19 }
   0x5   :  { %40 = dma.hbm_to_vmem [thread:$0]  %s36_s17, 128, %s38_s19, [#allocation7]  }
   0x6   :  { %s23_s24 = sshll.u32 %s366_s23, 4  ;;  %s49_s27 = sshll.u32 %s412_s2, 4  ;;  %s24_s24 = int_to_ptr.vmem [resolvable:$true] %s23_s24  ;;  %s50_s27 = int_to_ptr.hbm [resolvable:$true] %s49_s27 }
   0x7   :  { %26 = dma.hbm_to_vmem [thread:$0]  %s22_s22, 128, %s24_s24, [#allocation4]  }
   0x8   :  { %s63_s29 = sshll.u32 %s413_s3, 4  ;;  %s367_s30 = smov [#allocation8]   ;;  %s64_s29 = int_to_ptr.hbm [resolvable:$true] %s63_s29 }
   0x9   :  { %s51_s5 = sshll.u32 %s367_s30, 4  ;;  %s368_s0 = smov [#allocation9]   ;;  %s52_s5 = int_to_ptr.vmem [resolvable:$true] %s51_s5 }
   0xa   :  { %54 = dma.hbm_to_vmem [thread:$0]  %s50_s27, 128, %s52_s5, [#allocation7]  }
   0xb   :  { %s65_s6 = sshll.u32 %s368_s0, 4  ;;  %s66_s6 = int_to_ptr.vmem [resolvable:$true] %s65_s6 }
   0xc   :  { %68 = dma.hbm_to_vmem [thread:$0]  %s64_s29, 128, %s66_s6, [#allocation10]  }
   0xd   :  { %357 = dma.done.wait [#allocation4], 128  }
   0xe   :  { %358 = vsyncadd [#allocation4], 4294967168 }
   0xf   :  { %359 = dma.done.wait [#allocation7], 256  }
  0x10   :  { %360 = vsyncadd [#allocation7], 4294967040 }
  0x11   :  { %361 = dma.done.wait [#allocation10], 128  }
  0x12   :  { %362 = vsyncadd [#allocation10], 4294967168  ;;  %v97_v0 = vld [vmem:[#allocation3] sm:$0xff]  ;;  %v100_v1 = vld [vmem:[#allocation9] sm:$0xff]  ;;  %vm159_vm4 = vcmask 7168   ;;  %s369_s2 = smov [#allocation11]  }
  0x13   :  { %v98_v2 = vld [vmem:[#allocation6] sm:$0xff]  ;;  %v135_v3 = vsub.f32 %v97_v0, %v100_v1  ;;  %v99_v5 = vld [vmem:[#allocation8] sm:$0xff]  ;;  %s206_s3 = sshll.u32 %s369_s2, 4  ;;  %s208_s10 = sshll.u32 %s414_s4, 4  ;;  %s207_s3 = int_to_ptr.vmem [resolvable:$true] %s206_s3  ;;  %s209_s10 = int_to_ptr.hbm [resolvable:$true] %s208_s10 }
  0x14   :  { %v101_v4 = vsub.f32 %v97_v0, %v98_v2  ;;  %v118_v8 = vsub.f32 %v97_v0, %v99_v5 }
  0x15   :  { %v136_v6 = vadd.f32 1e-06, %v135_v3 }
  0x16   :  { %v102_v7 = vadd.f32 1e-06, %v101_v4  ;;  %v119_v11 = vadd.f32 1e-06, %v118_v8  ;;  %v190_v4 = vlaneseq }
  0x17   :  { %v137_v9 = vmul.f32 %v136_v6, %v136_v6 }
  0x18   :  { %v103_v10 = vmul.f32 %v102_v7, %v102_v7  ;;  %v120_v12 = vmul.f32 %v119_v11, %v119_v11  ;;  %v191_v5 = vand.u32 127, %v190_v4 }
  0x19   :  { %138 = vadd.xlane.f32.xlu1 %v137_v9 }
  0x1a   :  { %104 = vadd.xlane.f32.xlu0 %v103_v10  ;;  %vm194_vm7 = vcmp.eq.s32.totalorder %v191_v5, 1  ;;  %vm192_vm8 = vcmp.eq.s32.totalorder %v191_v5, 0 }
  0x22   :  { %121 = vadd.xlane.f32.xlu0 %v120_v12 }
  0x8c   :  { %v139_v13 = vpop.xlane.xlu1 %138 }
  0x8d   :  { %v105_v14 = vpop.xlane.xlu0 %104  ;;  %231 = vrsqrt.f32 %v139_v13  ;;  %vm147_vm1 = vcmp.eq.f32.partialorder %v139_v13, inf  ;;  %v150_v33 = vand.u32 2147483648, %v139_v13  ;;  %vm149_vm2 = vcmp.eq.f32.partialorder %v139_v13, 0.0 }
  0x8e   :  { %233 = vrsqrt.f32 %v105_v14  ;;  %vm113_vm0 = vcmp.eq.f32.partialorder %v105_v14, inf  ;;  %v116_v35 = vand.u32 2147483648, %v105_v14  ;;  %vm115_vm3 = vcmp.eq.f32.partialorder %v105_v14, 0.0 }
  0x93   :  { %v232_v15 = vpop.eup %231 }
  0x94   :  { %v234_v16 = vpop.eup %233  ;;  %v141_v17 = vmul.f32 %v232_v15, %v139_v13 }
  0x95   :  { %v122_v18 = vpop.xlane.xlu0 %121  ;;  %v107_v19 = vmul.f32 %v234_v16, %v105_v14 }
  0x96   :  { %235 = vrsqrt.f32 %v122_v18  ;;  %v142_v20 = vmul.f32 %v232_v15, %v141_v17  ;;  %vm130_vm5 = vcmp.eq.f32.partialorder %v122_v18, inf  ;;  %v133_v46 = vand.u32 2147483648, %v122_v18 }
  0x97   :  { %v108_v21 = vmul.f32 %v234_v16, %v107_v19  ;;  %vm132_vm6 = vcmp.eq.f32.partialorder %v122_v18, 0.0 }
  0x98   :  { %v143_v22 = vmul.f32 0.5, %v142_v20 }
  0x99   :  { %v109_v23 = vmul.f32 0.5, %v108_v21 }
  0x9a   :  { %v144_v24 = vsub.f32 1.5, %v143_v22 }
  0x9b   :  { %v110_v26 = vsub.f32 1.5, %v109_v23 }
  0x9c   :  { %v236_v25 = vpop.eup %235  ;;  %v145_v28 = vmul.f32 %v232_v15, %v144_v24 }
  0x9d   :  { %v124_v27 = vmul.f32 %v236_v25, %v122_v18  ;;  %v111_v29 = vmul.f32 %v234_v16, %v110_v26 }
  0x9e   :  { %v146_v31 = vmul.f32 %v145_v28, %v139_v13 }
  0x9f   :  { %v125_v30 = vmul.f32 %v236_v25, %v124_v27  ;;  %v112_v32 = vmul.f32 %v111_v29, %v105_v14 }
  0xa0   :  { %v148_v36 = vsel %vm147_vm1, %v139_v13, %v146_v31 }
  0xa1   :  { %v126_v34 = vmul.f32 0.5, %v125_v30  ;;  %v114_v37 = vsel %vm113_vm0, %v105_v14, %v112_v32  ;;  %v151_v38 = vsel %vm149_vm2, %v150_v33, %v148_v36 }
  0xa2   :  { %v117_v40 = vsel %vm115_vm3, %v116_v35, %v114_v37 }
  0xa3   :  { %v127_v39 = vsub.f32 1.5, %v126_v34  ;;  %v155_v41 = vsub.f32 %v117_v40, %v151_v38 }
  0xa5   :  { %v128_v42 = vmul.f32 %v236_v25, %v127_v39  ;;  %v156_v43 = vadd.f32 0.1, %v155_v41 }
  0xa7   :  { %v129_v44 = vmul.f32 %v128_v42, %v122_v18  ;;  %v157_v45 = vmax.f32 %v156_v43, 0.0 }
  0xa9   :  { %v131_v47 = vsel %vm130_vm5, %v122_v18, %v129_v44  ;;  %v174_v48 = vsel %vm159_vm4, %v157_v45, 0.0 }
  0xaa   :  { %v134_v49 = vsel %vm132_vm6, %v133_v46, %v131_v47  ;;  %175 = vadd.xlane.f32.xlu2 %v174_v48 }
  0xab   :  { %v152_v50 = vsub.f32 %v117_v40, %v134_v49 }
  0xad   :  { %v153_v51 = vadd.f32 0.1, %v152_v50 }
  0xaf   :  { %v154_v52 = vmax.f32 %v153_v51, 0.0 }
  0xb1   :  { %v160_v53 = vsel %vm159_vm4, %v154_v52, 0.0 }
  0xb2   :  { %161 = vadd.xlane.f32.xlu1 %v160_v53 }
 0x11d   :  { %v176_v54 = vpop.xlane.xlu2 %175 }
 0x11e   :  { %v177_v55 = vrot.slane %v176_v54, 4 }
 0x120   :  { %v178_v56 = vadd.f32 %v177_v55, %v176_v54 }
 0x122   :  { %v179_v57 = vrot.slane %v178_v56, 2 }
 0x124   :  { %v180_v61 = vadd.f32 %v179_v57, %v178_v56 }
 0x125   :  { %v162_v58 = vpop.xlane.xlu1 %161 }
 0x126   :  { %v163_v59 = vrot.slane %v162_v58, 4  ;;  %v181_v0 = vrot.slane %v180_v61, 1 }
 0x128   :  { %v164_v60 = vadd.f32 %v163_v59, %v162_v58  ;;  %v182_v3 = vadd.f32 %v181_v0, %v180_v61 }
 0x12a   :  { %v165_v62 = vrot.slane %v164_v60, 2 }
 0x12c   :  { %v166_v63 = vadd.f32 %v165_v62, %v164_v60 }
 0x12e   :  { %v167_v1 = vrot.slane %v166_v63, 1 }
 0x130   :  { %v168_v2 = vadd.f32 %v167_v1, %v166_v63 }
 0x132   :  { %222 = vpush %v168_v2 }
 0x133   :  { %224 = vpush %v182_v3 }
 0x163   :  { %s223_s7 = spop %222 }
 0x164   :  { %v198_v6 = vstv %s223_s7  ;;  %s225_s11 = spop %224 }
 0x165   :  { %v196_v7 = vstv %s225_s11 }
 0x166   :  { %v197_v8 = vsel %vm194_vm7, %v196_v7, 0.0 }
 0x167   :  { %v199_v9 = vsel %vm192_vm8, %v198_v6, %v197_v8 }
 0x168   :  { %200 = vst [vmem:[#allocation11] sm:$0xff] %v199_v9 }
 0x169   :  { %211 = dma.vmem_to_hbm [thread:$0]  %s207_s3, 128, %s209_s10, [#allocation5]  }
 0x16a   :  { %363 = dma.done.wait [#allocation5], 128  }
 0x16b   :  { %364 = vsyncadd [#allocation5], 4294967168 }
 0x16c   :  { %216 = vsyncpa [#allocation4], 1 }
 0x16d   :  { %217 = vsyncpa [#allocation7], 1 }
 0x16e   :  { %218 = vsyncpa [#allocation10], 1 }
 0x16f   :  { %219 = vsyncpa [#allocation5], 1 }

</bundles_post_ra>
